<compile_context>
chip_gen: v7x
topology: tpu7x:2x2x1
jax: 0.10.0
libtpu: 0.0.40
codegen_flags: <defaults>
</compile_context>

<pallas_src>
import functools

import jax
import jax.numpy as jnp
from jax.experimental import pallas as pl
from jax.experimental.pallas import tpu as pltpu

NEG_SLOPE = 0.2      # GATv2Conv default negative_slope
MASK_VAL = -1e30     # mask fill; keep logits/softmax in f32 (bf16 would overflow)


def _round_up(v, m):
    return (v + m - 1) // m * m


# ---------------------------------------------------------------------------
# Kernel 1: node projections (lin_l / lin_r) + transposed copy of x_l.
# ---------------------------------------------------------------------------
def _proj_kernel(x_ref, wl_ref, bl_ref, wr_ref, br_ref,
                 xl_ref, xr_ref, xlt_ref):
    x = x_ref[...]                                                    # (tn, Fp)
    xl = jnp.dot(x, wl_ref[...], preferred_element_type=jnp.float32) + bl_ref[...]
    xr = jnp.dot(x, wr_ref[...], preferred_element_type=jnp.float32) + br_ref[...]
    xl_ref[...] = xl
    xr_ref[...] = xr
    # One-time transpose so the attention kernel keeps source nodes on lanes.
    xlt_ref[...] = xl.T                                               # (Cp, tn)


# ---------------------------------------------------------------------------
# Kernel 2: tiled GATv2 attention, online softmax, aggregation, bias, ELU,
# log_softmax.  Grid = (dst blocks [parallel], src blocks [arbitrary]).
# ---------------------------------------------------------------------------
def _attn_kernel(att_ref, xr_ref, xlt_ref, xl_ref, adj_ref, bias_ref,
                 o_ref, m_sc, l_sc, acc_sc, *, c_real):
    j = pl.program_id(1)

    @pl.when(j == 0)
    def _init():
        m_sc[...] = jnp.full_like(m_sc, MASK_VAL)
        l_sc[...] = jnp.zeros_like(l_sc)
        acc_sc[...] = jnp.zeros_like(acc_sc)

    xr = xr_ref[...]                       # (tile_i, C_pad)  dst projections
    xlt = xlt_ref[...]                     # (C_pad, tile_j)  src projections^T
    valid = adj_ref[...] > 0               # (tile_i, tile_j) int8 -> bool

    tile_i = xr.shape[0]
    tile_j = xlt.shape[1]

    # e[i, j] = sum_c att[c] * leaky_relu(xr[i, c] + xl[j, c])
    # Lane axis = source nodes (full 128-lane vregs); channel loop is a short
    # static unroll of VPU adds/selects/FMAs (att scalars read from SMEM).
    e = jnp.zeros((tile_i, tile_j), jnp.float32)
    for c in range(c_real):
        a_c = att_ref[0, c]                                  # SMEM scalar
        pair = xr[:, c:c + 1] + xlt[c:c + 1, :]              # (tile_i, tile_j)
        pair = jnp.where(pair > 0, pair, NEG_SLOPE * pair)
        e = e + a_c * pair

    e = jnp.where(valid, e, MASK_VAL)

    # Online softmax update (f32 throughout).
    m_prev = m_sc[...]
    m_new = jnp.maximum(m_prev, jnp.max(e, axis=-1, keepdims=True))
    corr = jnp.exp(m_prev - m_new)
    p = jnp.where(valid, jnp.exp(e - m_new), 0.0)            # masked rows -> 0
    l_sc[...] = corr * l_sc[...] + jnp.sum(p, axis=-1, keepdims=True)
    acc_sc[...] = corr * acc_sc[...] + jnp.dot(
        p, xl_ref[...], preferred_element_type=jnp.float32)
    m_sc[...] = m_new

    @pl.when(j == pl.num_programs(1) - 1)
    def _finalize():
        inv_l = pl.reciprocal(jnp.maximum(l_sc[...], 1e-30), approx=True)
        out = acc_sc[...] * inv_l + bias_ref[...]            # (tile_i, C_pad)
        # ELU
        out = jnp.where(out > 0, out, jnp.exp(jnp.minimum(out, 0.0)) - 1.0)
        # log_softmax over the real channels only (padded lanes masked out).
        ch = jax.lax.broadcasted_iota(jnp.int32, out.shape, 1)
        out = jnp.where(ch < c_real, out, MASK_VAL)
        mx = jnp.max(out, axis=-1, keepdims=True)
        z = out - mx
        lse = jnp.log(jnp.sum(jnp.exp(z), axis=-1, keepdims=True))
        o_ref[...] = z - lse


# ---------------------------------------------------------------------------
# Wrapper: padding, int8 adjacency construction, the two pallas_calls.
# ---------------------------------------------------------------------------
def gatv2_net(x, edge_index, params, *, tile_i=128, tile_j=128):
    """Forward pass of Net (eval mode). x: (N, F_in) f32, edge_index: (2, E)."""
    n, f_in = x.shape
    c = params["wl"].shape[1]

    tile_n = 128
    f_pad = _round_up(f_in, 128)
    c_pad = _round_up(c, 128)
    n_pad = _round_up(n, max(tile_i, tile_j, tile_n))

    # Zero-pad to lane/MXU friendly shapes.
    x_p = jnp.pad(x.astype(jnp.float32), ((0, n_pad - n), (0, f_pad - f_in)))
    wl_p = jnp.pad(params["wl"], ((0, f_pad - f_in), (0, c_pad - c)))
    wr_p = jnp.pad(params["wr"], ((0, f_pad - f_in), (0, c_pad - c)))
    bl_p = jnp.pad(params["bl"], ((0, 0), (0, c_pad - c)))
    br_p = jnp.pad(params["br"], ((0, 0), (0, c_pad - c)))
    att_p = jnp.pad(params["att"], ((0, 0), (0, c_pad - c)))
    bias_p = jnp.pad(params["bias"], ((0, 0), (0, c_pad - c)))

    # Dense adjacency as int8; adj[dst, src] = 1, self-loops forced (PyG
    # add_self_loops=True).
    # TODO(synk): duplicate edges collapse to one entry (differs from PyG on
    # multigraphs); for very large N build adj tiles on the fly from a CSR
    # edge list via scalar prefetch instead of a dense N^2 mask.
    src, dst = edge_index[0], edge_index[1]
    adj = jnp.zeros((n_pad, n_pad), jnp.int8).at[dst, src].set(1)
    diag = jnp.arange(n)
    adj = adj.at[diag, diag].set(1)

    # --- projection kernel ---
    proj_cost = pl.CostEstimate(
        flops=4 * n_pad * f_pad * c_pad,
        transcendentals=0,
        bytes_accessed=4 * (n_pad * f_pad + 2 * f_pad * c_pad + 3 * n_pad * c_pad),
    )
    xl, xr, xl_t = pl.pallas_call(
        _proj_kernel,
        out_shape=(
            jax.ShapeDtypeStruct((n_pad, c_pad), jnp.float32),   # xl
            jax.ShapeDtypeStruct((n_pad, c_pad), jnp.float32),   # xr
            jax.ShapeDtypeStruct((c_pad, n_pad), jnp.float32),   # xl^T
        ),
        grid=(n_pad // tile_n,),
        in_specs=[
            pl.BlockSpec((tile_n, f_pad), lambda i: (i, 0)),     # x
            pl.BlockSpec((f_pad, c_pad), lambda i: (0, 0)),      # wl
            pl.BlockSpec((1, c_pad), lambda i: (0, 0)),          # bl
            pl.BlockSpec((f_pad, c_pad), lambda i: (0, 0)),      # wr
            pl.BlockSpec((1, c_pad), lambda i: (0, 0)),          # br
        ],
        out_specs=(
            pl.BlockSpec((tile_n, c_pad), lambda i: (i, 0)),
            pl.BlockSpec((tile_n, c_pad), lambda i: (i, 0)),
            pl.BlockSpec((c_pad, tile_n), lambda i: (0, i)),
        ),
        compiler_params=pltpu.CompilerParams(
            dimension_semantics=("parallel",)),
        cost_estimate=proj_cost,
    )(x_p, wl_p, bl_p, wr_p, br_p)

    # --- tiled attention + aggregation + epilogue ---
    attn_cost = pl.CostEstimate(
        flops=n_pad * n_pad * (6 * c + 2 * c_pad) + 8 * n_pad * n_pad,
        transcendentals=n_pad * n_pad + 2 * n_pad * c_pad,
        bytes_accessed=n_pad * n_pad + 4 * (4 * n_pad * c_pad),
    )
    out_pad = pl.pallas_call(
        functools.partial(_attn_kernel, c_real=c),
        out_shape=jax.ShapeDtypeStruct((n_pad, c_pad), jnp.float32),
        grid=(n_pad // tile_i, n_pad // tile_j),
        in_specs=[
            pl.BlockSpec(memory_space=pltpu.MemorySpace.SMEM),    # att (1, Cp)
            pl.BlockSpec((tile_i, c_pad), lambda i, j: (i, 0)),   # xr (dst)
            pl.BlockSpec((c_pad, tile_j), lambda i, j: (0, j)),   # xl^T (src)
            pl.BlockSpec((tile_j, c_pad), lambda i, j: (j, 0)),   # xl (src)
            pl.BlockSpec((tile_i, tile_j), lambda i, j: (i, j)),  # adj (int8)
            pl.BlockSpec((1, c_pad), lambda i, j: (0, 0)),        # conv bias
        ],
        out_specs=pl.BlockSpec((tile_i, c_pad), lambda i, j: (i, 0)),
        scratch_shapes=[
            pltpu.VMEM((tile_i, 1), jnp.float32),      # running max m
            pltpu.VMEM((tile_i, 1), jnp.float32),      # running sum l
            pltpu.VMEM((tile_i, c_pad), jnp.float32),  # running weighted acc
        ],
        compiler_params=pltpu.CompilerParams(
            dimension_semantics=("parallel", "arbitrary"),
            vmem_limit_bytes=32 * 1024 * 1024),
        cost_estimate=attn_cost,
    )(att_p, xr, xl_t, xl, adj, bias_p)

    return out_pad[:n, :c]


def init_params(key, in_channels, out_channels):
    """Deterministic glorot-style init matching GATv2Conv(heads=1) shapes."""
    k1, k2, k3 = jax.random.split(key, 3)
    s_lin = (6.0 / (in_channels + out_channels)) ** 0.5
    s_att = (6.0 / (1 + out_channels)) ** 0.5
    return {
        "wl": jax.random.uniform(k1, (in_channels, out_channels), jnp.float32,
                                 -s_lin, s_lin),
        "bl": jnp.zeros((1, out_channels), jnp.float32),
        "wr": jax.random.uniform(k2, (in_channels, out_channels), jnp.float32,
                                 -s_lin, s_lin),
        "br": jnp.zeros((1, out_channels), jnp.float32),
        "att": jax.random.uniform(k3, (1, out_channels), jnp.float32,
                                  -s_att, s_att),
        "bias": jnp.zeros((1, out_channels), jnp.float32),
    }


def _reference(x, edge_index, params):
    """Pure-JAX reference for a sanity check."""
    n = x.shape[0]
    src, dst = edge_index[0], edge_index[1]
    adj = jnp.zeros((n, n), jnp.float32).at[dst, src].set(1.0)
    adj = adj.at[jnp.arange(n), jnp.arange(n)].set(1.0)
    xl = x @ params["wl"] + params["bl"]
    xr = x @ params["wr"] + params["br"]
    pair = xr[:, None, :] + xl[None, :, :]
    leaky = jnp.where(pair > 0, pair, NEG_SLOPE * pair)
    e = jnp.sum(leaky * params["att"][0], axis=-1)
    e = jnp.where(adj > 0, e, MASK_VAL)
    alpha = jax.nn.softmax(e, axis=-1)
    out = alpha @ xl + params["bias"]
    out = jnp.where(out > 0, out, jnp.exp(jnp.minimum(out, 0.0)) - 1.0)
    return jax.nn.log_softmax(out, axis=-1)


if __name__ == "__main__":
    key = jax.random.PRNGKey(0)
    k_x, k_e, k_p = jax.random.split(key, 3)

    N, F_IN, F_OUT, E = 16, 16, 32, 48
    x = jax.random.normal(k_x, (N, F_IN), jnp.float32)
    edge_index = jax.random.randint(k_e, (2, E), 0, N, jnp.int32)
    params = init_params(k_p, F_IN, F_OUT)

    out = gatv2_net(x, edge_index, params)
    out = jax.block_until_ready(out)

    ref = _reference(x, edge_index, params)
    assert out.shape == (N, F_OUT)
    assert bool(jnp.isfinite(out).all()), "non-finite output"
    # Tolerance covers the EUP approximate-reciprocal softmax denominator.
    assert jnp.allclose(out, ref, atol=1e-2, rtol=1e-2), "mismatch vs reference"

    print("KERNEL_OK")
</pallas_src>

<mosaic_0001>
module attributes {stable_mosaic.version = 11 : i64} {
  func.func @_proj_kernel(%arg0: i32, %arg1: memref<128x128xf32, #tpu.memory_space<vmem>>, %arg2: memref<128x128xf32, #tpu.memory_space<vmem>>, %arg3: memref<1x128xf32, #tpu.memory_space<vmem>>, %arg4: memref<128x128xf32, #tpu.memory_space<vmem>>, %arg5: memref<1x128xf32, #tpu.memory_space<vmem>>, %arg6: memref<128x128xf32, #tpu.memory_space<vmem>>, %arg7: memref<128x128xf32, #tpu.memory_space<vmem>>, %arg8: memref<128x128xf32, #tpu.memory_space<vmem>>) attributes {dimension_semantics = [#tpu.dimension_semantics<parallel>], iteration_bounds = array<i64: 1>, scalar_prefetch = 0 : i64, scratch_operands = 0 : i64, tpu.core_type = #tpu.core_type<tc>, window_params = [{transform_indices = @transform_0, window_bounds = array<i64: 128, 128>}, {pipeline_mode = #tpu.pipeline_mode<synchronous>, transform_indices = @transform_1, window_bounds = array<i64: 128, 128>}, {pipeline_mode = #tpu.pipeline_mode<synchronous>, transform_indices = @transform_2, window_bounds = array<i64: 1, 128>}, {pipeline_mode = #tpu.pipeline_mode<synchronous>, transform_indices = @transform_3, window_bounds = array<i64: 128, 128>}, {pipeline_mode = #tpu.pipeline_mode<synchronous>, transform_indices = @transform_4, window_bounds = array<i64: 1, 128>}, {transform_indices = @transform_5, window_bounds = array<i64: 128, 128>}, {transform_indices = @transform_6, window_bounds = array<i64: 128, 128>}, {transform_indices = @transform_7, window_bounds = array<i64: 128, 128>}]} {
    %c0 = arith.constant 0 : index
    %c0_0 = arith.constant 0 : index
    %0 = vector.load %arg1[%c0, %c0_0] : memref<128x128xf32, #tpu.memory_space<vmem>>, vector<128x128xf32>
    %c0_1 = arith.constant 0 : index
    %c0_2 = arith.constant 0 : index
    %1 = vector.load %arg2[%c0_1, %c0_2] : memref<128x128xf32, #tpu.memory_space<vmem>>, vector<128x128xf32>
    %cst = arith.constant dense<0.000000e+00> : vector<128x128xf32>
    %2 = tpu.matmul %0, %1, %cst {dimension_numbers = #tpu.dot_dimension_numbers<[1], [0], [0], [1], [0, 0, 1, 1], [], []>} : vector<128x128xf32>, vector<128x128xf32>, vector<128x128xf32> -> vector<128x128xf32>
    %c0_3 = arith.constant 0 : index
    %c0_4 = arith.constant 0 : index
    %3 = vector.load %arg3[%c0_3, %c0_4] : memref<1x128xf32, #tpu.memory_space<vmem>>, vector<1x128xf32>
    %4 = vector.broadcast %3 : vector<1x128xf32> to vector<128x128xf32>
    %5 = arith.addf %2, %4 : vector<128x128xf32>
    %c0_5 = arith.constant 0 : index
    %c0_6 = arith.constant 0 : index
    %6 = vector.load %arg4[%c0_5, %c0_6] : memref<128x128xf32, #tpu.memory_space<vmem>>, vector<128x128xf32>
    %cst_7 = arith.constant dense<0.000000e+00> : vector<128x128xf32>
    %7 = tpu.matmul %0, %6, %cst_7 {dimension_numbers = #tpu.dot_dimension_numbers<[1], [0], [0], [1], [0, 0, 1, 1], [], []>} : vector<128x128xf32>, vector<128x128xf32>, vector<128x128xf32> -> vector<128x128xf32>
    %c0_8 = arith.constant 0 : index
    %c0_9 = arith.constant 0 : index
    %8 = vector.load %arg5[%c0_8, %c0_9] : memref<1x128xf32, #tpu.memory_space<vmem>>, vector<1x128xf32>
    %9 = vector.broadcast %8 : vector<1x128xf32> to vector<128x128xf32>
    %10 = arith.addf %7, %9 : vector<128x128xf32>
    %c0_10 = arith.constant 0 : index
    %c0_11 = arith.constant 0 : index
    %11 = vector.load %arg6[%c0_10, %c0_11] : memref<128x128xf32, #tpu.memory_space<vmem>>, vector<128x128xf32>
    tpu.vector_store %arg6[%c0_10, %c0_11], %5 {strides = array<i32>} : memref<128x128xf32, #tpu.memory_space<vmem>>, vector<128x128xf32>,
    %c0_12 = arith.constant 0 : index
    %c0_13 = arith.constant 0 : index
    %12 = vector.load %arg7[%c0_12, %c0_13] : memref<128x128xf32, #tpu.memory_space<vmem>>, vector<128x128xf32>
    tpu.vector_store %arg7[%c0_12, %c0_13], %10 {strides = array<i32>} : memref<128x128xf32, #tpu.memory_space<vmem>>, vector<128x128xf32>,
    %13 = tpu.transpose %5, [1, 0] : vector<128x128xf32> -> vector<128x128xf32>
    %c0_14 = arith.constant 0 : index
    %c0_15 = arith.constant 0 : index
    %14 = vector.load %arg8[%c0_14, %c0_15] : memref<128x128xf32, #tpu.memory_space<vmem>>, vector<128x128xf32>
    tpu.vector_store %arg8[%c0_14, %c0_15], %13 {strides = array<i32>} : memref<128x128xf32, #tpu.memory_space<vmem>>, vector<128x128xf32>,
    return
  }
  func.func @transform_0(%arg0: i32) -> (i32, i32) {
    %c0_i32 = arith.constant 0 : i32
    %c0_i32_0 = arith.constant 0 : i32
    return %arg0, %c0_i32 : i32, i32
  }
  func.func @transform_1(%arg0: i32) -> (i32, i32) {
    %c0_i32 = arith.constant 0 : i32
    %c0_i32_0 = arith.constant 0 : i32
    %c0_i32_1 = arith.constant 0 : i32
    return %c0_i32, %c0_i32_0 : i32, i32
  }
  func.func @transform_2(%arg0: i32) -> (i32, i32) {
    %c0_i32 = arith.constant 0 : i32
    %c0_i32_0 = arith.constant 0 : i32
    %c0_i32_1 = arith.constant 0 : i32
    return %c0_i32, %c0_i32_0 : i32, i32
  }
  func.func @transform_3(%arg0: i32) -> (i32, i32) {
    %c0_i32 = arith.constant 0 : i32
    %c0_i32_0 = arith.constant 0 : i32
    %c0_i32_1 = arith.constant 0 : i32
    return %c0_i32, %c0_i32_0 : i32, i32
  }
  func.func @transform_4(%arg0: i32) -> (i32, i32) {
    %c0_i32 = arith.constant 0 : i32
    %c0_i32_0 = arith.constant 0 : i32
    %c0_i32_1 = arith.constant 0 : i32
    return %c0_i32, %c0_i32_0 : i32, i32
  }
  func.func @transform_5(%arg0: i32) -> (i32, i32) {
    %c0_i32 = arith.constant 0 : i32
    %c0_i32_0 = arith.constant 0 : i32
    return %arg0, %c0_i32 : i32, i32
  }
  func.func @transform_6(%arg0: i32) -> (i32, i32) {
    %c0_i32 = arith.constant 0 : i32
    %c0_i32_0 = arith.constant 0 : i32
    return %arg0, %c0_i32 : i32, i32
  }
  func.func @transform_7(%arg0: i32) -> (i32, i32) {
    %c0_i32 = arith.constant 0 : i32
    %c0_i32_0 = arith.constant 0 : i32
    return %c0_i32, %arg0 : i32, i32
  }
}

</mosaic_0001>

<bundles_post_ra>
// kernel: tpu_custom_call.1
= control target key start
LH: loop header
LB: loop body
LE: loop exit
PB: predicated region body
PF: predicated region fallthrough
CT: control target
= control target key end

     0   :  { %13 = vsyncpa [#allocation3], 0  ;;  %s1092_s0 = inlined_call_operand.hbm [shape: f32[128,128], index: 0, kind: input, shape index: {}]   ;;  %s1093_s1 = inlined_call_operand.hbm [shape: f32[128,128], index: 1, kind: input, shape index: {}]   ;;  %s1094_s2 = inlined_call_operand.vmem [shape: f32[1,128], index: 2, kind: input, shape index: {}]   ;;  %s1095_s3 = inlined_call_operand.hbm [shape: f32[128,128], index: 3, kind: input, shape index: {}]   ;;  %s1096_s4 = inlined_call_operand.vmem [shape: f32[1,128], index: 4, kind: input, shape index: {}]   ;;  %s1097_s5 = inlined_call_operand.hbm [shape: f32[128,128], index: 5, kind: output, shape index: {0}]   ;;  %s1098_s6 = inlined_call_operand.hbm [shape: f32[128,128], index: 6, kind: output, shape index: {1}]   ;;  %s1099_s7 = inlined_call_operand.hbm [shape: f32[128,128], index: 7, kind: output, shape index: {2}]  }
   0x1   :  { %14 = vsyncpa [#allocation6], 0 }
   0x2   :  { %15 = vsyncpa [#allocation4], 0 }
   0x3   :  { %16 = vsyncpa [#allocation10], 0  ;;  %s937_s24 = smov [#allocation5]   ;;  %s938_s26 = smov [#allocation2]  }
   0x4   :  { %s34_s25 = sshll.u32 %s937_s24, 4  ;;  %s22_s27 = sshll.u32 %s938_s26, 4  ;;  %s35_s25 = int_to_ptr.vmem [resolvable:$true] %s34_s25  ;;  %s985_s27 = int_to_ptr.vmem [resolvable:$true] %s22_s27 }
   0x5   :  { %s797_s30 = scalar_lea.hbm %s1093_s1, 2048 }
   0x6   :  { %p798_p0 = scmp.ne.s32.totalorder %s1093_s1, %s797_s30  ;;  %p801_p1 = scmp.lt.u32.totalorder %s797_s30, %s1093_s1 }
   0x8   :  { %p803_p2 = pnand %p801_p1, %p798_p0 }
   0xa   :  { %806 = shalt.err (!%p803_p2)
}
   0xb   :  { %s807_s12 = scalar_lea.vmem %s35_s25, 2048  ;;  %p812_p4 = scmp.lt.s32.totalorder %s35_s25, %s35_s25 }
   0xc   :  { %p808_p3 = scmp.ne.s32.totalorder %s35_s25, %s807_s12  ;;  %p813_p5 = scmp.lt.s32.totalorder %s807_s12, %s807_s12 }
   0xe   :  { %p814_p6 = por %p813_p5, %p812_p4 }
  0x10   :  { %p815_p7 = pnand %p814_p6, %p808_p3 }
  0x12   :  { %818 = shalt.err (!%p815_p7)
}
  0x13   :  { %s939_s13 = smov 128   ;;  %s940_s14 = smov 8  }
  0x14   :  { %40 = dma.hbm_to_vmem [thread:$0]  %s1093_s1, 2048, %s35_s25, [#allocation6], %s939_s13, %s939_s13, %s940_s14  }
  0x15   :  { %s819_s19 = scalar_lea.hbm %s1092_s0, 2048 }
  0x16   :  { %p820_p8 = scmp.ne.s32.totalorder %s1092_s0, %s819_s19  ;;  %p823_p9 = scmp.lt.u32.totalorder %s819_s19, %s1092_s0 }
  0x18   :  { %p825_p10 = pnand %p823_p9, %p820_p8 }
  0x1a   :  { %828 = shalt.err (!%p825_p10)
}
  0x1b   :  { %s829_s24 = scalar_lea.vmem %s985_s27, 2048  ;;  %p834_p12 = scmp.lt.s32.totalorder %s985_s27, %s985_s27 }
  0x1c   :  { %p830_p11 = scmp.ne.s32.totalorder %s985_s27, %s829_s24  ;;  %p835_p13 = scmp.lt.s32.totalorder %s829_s24, %s829_s24 }
  0x1e   :  { %p836_p0 = por %p835_p13, %p834_p12 }
  0x20   :  { %p837_p1 = pnand %p836_p0, %p830_p11 }
  0x22   :  { %840 = shalt.err (!%p837_p1)
}
  0x23   :  { %28 = dma.hbm_to_vmem [thread:$0]  %s1092_s0, 2048, %s985_s27, [#allocation3], %s939_s13, %s939_s13, %s940_s14  }
  0x24   :  { %s941_s26 = smov [#allocation7]   ;;  %s841_s8 = scalar_lea.hbm %s1095_s3, 2048 }
  0x25   :  { %s48_s28 = sshll.u32 %s941_s26, 4  ;;  %p842_p2 = scmp.ne.s32.totalorder %s1095_s3, %s841_s8  ;;  %s49_s28 = int_to_ptr.vmem [resolvable:$true] %s48_s28 }
  0x26   :  { %p845_p3 = scmp.lt.u32.totalorder %s841_s8, %s1095_s3 }
  0x28   :  { %p847_p4 = pnand %p845_p3, %p842_p2 }
  0x2a   :  { %850 = shalt.err (!%p847_p4)
}
  0x2b   :  { %s851_s15 = scalar_lea.vmem %s49_s28, 2048  ;;  %p856_p6 = scmp.lt.s32.totalorder %s49_s28, %s49_s28 }
  0x2c   :  { %p852_p5 = scmp.ne.s32.totalorder %s49_s28, %s851_s15  ;;  %p857_p7 = scmp.lt.s32.totalorder %s851_s15, %s851_s15 }
  0x2e   :  { %p858_p8 = por %p857_p7, %p856_p6 }
  0x30   :  { %p859_p9 = pnand %p858_p8, %p852_p5 }
  0x32   :  { %862 = shalt.err (!%p859_p9)
}
  0x33   :  { %54 = dma.hbm_to_vmem [thread:$0]  %s1095_s3, 2048, %s49_s28, [#allocation6], %s939_s13, %s939_s13, %s940_s14  }
  0x34   :  { %929 = dma.done.wait [#allocation3], 2048  }
  0x35   :  { %930 = vsyncadd [#allocation3], 4294965248 }
  0x36   :  { %931 = dma.done.wait [#allocation6], 4096  }
  0x37   :  { %932 = vsyncadd [#allocation6], 4294963200  ;;  %v82_v0 = vld [vmem:[#allocation5] sm:$0xff]  ;;  %v83_v1 = vld [vmem:[#allocation5 + $0x8] sm:$0xff]  ;;  %s943_s19 = smov [#allocation8]  }
  0x38   :  { %v84_v2 = vld [vmem:[#allocation5 + $0x10] sm:$0xff]  ;;  %v725_v3 = vpack.c.bf16 %v83_v1, %v82_v0  ;;  %v85_v4 = vld [vmem:[#allocation5 + $0x18] sm:$0xff]  ;;  %v86_v6 = vld [vmem:[#allocation5 + $0x20] sm:$0xff]  ;;  %s503_s20 = sshll.u32 %s943_s19, 4  ;;  %s504_s20 = int_to_ptr.vmem [resolvable:$true] %s503_s20 }
  0x39   :  { %v729_v5 = vpack.c.bf16 %v85_v4, %v84_v2  ;;  %v87_v7 = vld [vmem:[#allocation5 + $0x28] sm:$0xff]  ;;  %v66_v9 = vld [vmem:[#allocation2] sm:$0xff]  ;;  %v88_v10 = vld [vmem:[#allocation5 + $0x30] sm:$0xff] }
  0x3a   :  { %726 = vmatprep.subr.bf16.mxu0 %v725_v3  ;;  %v733_v8 = vpack.c.bf16 %v87_v7, %v86_v6  ;;  %v89_v11 = vld [vmem:[#allocation5 + $0x38] sm:$0xff]  ;;  %645 = vmatprep.mubr.f32.mxu0 %v66_v9  ;;  %v90_v13 = vld [vmem:[#allocation5 + $0x40] sm:$0xff]  ;;  %v91_v14 = vld [vmem:[#allocation5 + $0x48] sm:$0xff] }
  0x3b   :  { %728 = vmatpush3.bf16.msra.mxu0 %v725_v3  ;;  %701 = vmatprep.mubr.f32.mxu1 %v66_v9  ;;  %v737_v12 = vpack.c.bf16 %v89_v11, %v88_v10  ;;  %v250_v15 = vld [vmem:[#allocation7] sm:$0xff]  ;;  %v251_v16 = vld [vmem:[#allocation7 + $0x8] sm:$0xff]  ;;  %v252_v17 = vld [vmem:[#allocation7 + $0x10] sm:$0xff]  ;;  %v741_v21 = vpack.c.bf16 %v91_v14, %v90_v13 }
  0x3c   :  { %730 = vmatprep.subr.bf16.mxu0 %v729_v5  ;;  %v253_v18 = vld [vmem:[#allocation7 + $0x18] sm:$0xff]  ;;  %v757_v19 = vpack.c.bf16 %v251_v16, %v250_v15  ;;  %v254_v22 = vld [vmem:[#allocation7 + $0x20] sm:$0xff]  ;;  %v255_v23 = vld [vmem:[#allocation7 + $0x28] sm:$0xff] }
  0x3d   :  { %v761_v20 = vpack.c.bf16 %v253_v18, %v252_v17  ;;  %v92_v24 = vld [vmem:[#allocation5 + $0x50] sm:$0xff]  ;;  %v93_v25 = vld [vmem:[#allocation5 + $0x58] sm:$0xff]  ;;  %v765_v26 = vpack.c.bf16 %v255_v23, %v254_v22  ;;  %v94_v30 = vld [vmem:[#allocation5 + $0x60] sm:$0xff] }
  0x3e   :  { %758 = vmatprep.subr.bf16.mxu1 %v757_v19  ;;  %v745_v27 = vpack.c.bf16 %v93_v25, %v92_v24  ;;  %v256_v28 = vld [vmem:[#allocation7 + $0x30] sm:$0xff]  ;;  %v257_v29 = vld [vmem:[#allocation7 + $0x38] sm:$0xff]  ;;  %v95_v31 = vld [vmem:[#allocation5 + $0x68] sm:$0xff] }
  0x3f   :  { %732 = vmatpush3.bf16.msra.mxu0 %v729_v5  ;;  %760 = vmatpush3.bf16.msra.mxu1 %v757_v19  ;;  %v769_v32 = vpack.c.bf16 %v257_v29, %v256_v28  ;;  %v749_v33 = vpack.c.bf16 %v95_v31, %v94_v30  ;;  %v258_v34 = vld [vmem:[#allocation7 + $0x40] sm:$0xff]  ;;  %v259_v35 = vld [vmem:[#allocation7 + $0x48] sm:$0xff]  ;;  %v96_v36 = vld [vmem:[#allocation5 + $0x70] sm:$0xff] }
  0x40   :  { %734 = vmatprep.subr.bf16.mxu0 %v733_v8  ;;  %762 = vmatprep.subr.bf16.mxu1 %v761_v20  ;;  %v97_v37 = vld [vmem:[#allocation5 + $0x78] sm:$0xff]  ;;  %v773_v38 = vpack.c.bf16 %v259_v35, %v258_v34  ;;  %v260_v40 = vld [vmem:[#allocation7 + $0x50] sm:$0xff]  ;;  %v262_v43 = vld [vmem:[#allocation7 + $0x60] sm:$0xff] }
  0x41   :  { %v753_v39 = vpack.c.bf16 %v97_v37, %v96_v36  ;;  %v261_v41 = vld [vmem:[#allocation7 + $0x58] sm:$0xff]  ;;  %v263_v44 = vld [vmem:[#allocation7 + $0x68] sm:$0xff]  ;;  %v68_v47 = vld [vmem:[#allocation2 + $0x10] sm:$0xff] }
  0x42   :  { %v777_v42 = vpack.c.bf16 %v261_v41, %v260_v40  ;;  %v67_v45 = vld [vmem:[#allocation2 + $0x8] sm:$0xff]  ;;  %v781_v46 = vpack.c.bf16 %v263_v44, %v262_v43  ;;  %v264_v48 = vld [vmem:[#allocation7 + $0x70] sm:$0xff]  ;;  %v265_v49 = vld [vmem:[#allocation7 + $0x78] sm:$0xff] }
  0x43   :  { %736 = vmatpush3.bf16.msra.mxu0 %v733_v8  ;;  %764 = vmatpush3.bf16.msra.mxu1 %v761_v20  ;;  %v69_v50 = vld [vmem:[#allocation2 + $0x18] sm:$0xff]  ;;  %v785_v51 = vpack.c.bf16 %v265_v49, %v264_v48  ;;  %v70_v52 = vld [vmem:[#allocation2 + $0x20] sm:$0xff]  ;;  %v71_v53 = vld [vmem:[#allocation2 + $0x28] sm:$0xff] }
  0x44   :  { %738 = vmatprep.subr.bf16.mxu0 %v737_v12  ;;  %766 = vmatprep.subr.bf16.mxu1 %v765_v26  ;;  %v72_v54 = vld [vmem:[#allocation2 + $0x30] sm:$0xff]  ;;  %v73_v55 = vld [vmem:[#allocation2 + $0x38] sm:$0xff]  ;;  %v74_v56 = vld [vmem:[#allocation2 + $0x40] sm:$0xff] }
  0x45   :  { %v75_v57 = vld [vmem:[#allocation2 + $0x48] sm:$0xff]  ;;  %v76_v58 = vld [vmem:[#allocation2 + $0x50] sm:$0xff]  ;;  %v77_v59 = vld [vmem:[#allocation2 + $0x58] sm:$0xff] }
  0x46   :  { %v78_v60 = vld [vmem:[#allocation2 + $0x60] sm:$0xff]  ;;  %v79_v61 = vld [vmem:[#allocation2 + $0x68] sm:$0xff]  ;;  %v80_v62 = vld [vmem:[#allocation2 + $0x70] sm:$0xff] }
  0x47   :  { %740 = vmatpush3.bf16.msra.mxu0 %v737_v12  ;;  %768 = vmatpush3.bf16.msra.mxu1 %v765_v26  ;;  %v81_v63 = vld [vmem:[#allocation2 + $0x78] sm:$0xff]  ;;  %v547_v0 = vld [vmem:[%s1094_s2] ss:$0 sm:$0xff] }
  0x48   :  { %742 = vmatprep.subr.bf16.mxu0 %v741_v21  ;;  %770 = vmatprep.subr.bf16.mxu1 %v769_v32 }
  0x4b   :  { %744 = vmatpush3.bf16.msra.mxu0 %v741_v21  ;;  %772 = vmatpush3.bf16.msra.mxu1 %v769_v32 }
  0x4c   :  { %746 = vmatprep.subr.bf16.mxu0 %v745_v27  ;;  %774 = vmatprep.subr.bf16.mxu1 %v773_v38 }
  0x4f   :  { %748 = vmatpush3.bf16.msra.mxu0 %v745_v27  ;;  %776 = vmatpush3.bf16.msra.mxu1 %v773_v38 }
  0x50   :  { %750 = vmatprep.subr.bf16.mxu0 %v749_v33  ;;  %778 = vmatprep.subr.bf16.mxu1 %v777_v42 }
  0x53   :  { %752 = vmatpush3.bf16.msra.mxu0 %v749_v33  ;;  %780 = vmatpush3.bf16.msra.mxu1 %v777_v42  ;;  %v548_v33 = vld [vmem:[%s1096_s4] ss:$0 sm:$0xff]  ;;  %s942_s4 = smov [#allocation9]  }
  0x54   :  { %754 = vmatprep.subr.bf16.mxu0 %v753_v39  ;;  %782 = vmatprep.subr.bf16.mxu1 %v781_v46  ;;  %s515_s18 = sshll.u32 %s942_s4, 4  ;;  %s516_s18 = int_to_ptr.vmem [resolvable:$true] %s515_s18 }
  0x55   :  { %s863_s21 = scalar_lea.vmem %s516_s18, 2048  ;;  %p868_p11 = scmp.lt.s32.totalorder %s516_s18, %s516_s18 }
  0x56   :  { %p864_p10 = scmp.ne.s32.totalorder %s516_s18, %s863_s21  ;;  %p869_p12 = scmp.lt.s32.totalorder %s863_s21, %s863_s21 }
  0x57   :  { %756 = vmatpush3.bf16.msra.mxu0 %v753_v39  ;;  %784 = vmatpush3.bf16.msra.mxu1 %v781_v46 }
  0x58   :  { %786 = vmatprep.subr.bf16.mxu1 %v785_v51  ;;  %p870_p13 = por %p869_p12, %p868_p11 }
  0x5a   :  { %646 = vmatmul.mubr.f32.vlgmr.msra.gmra.mrb[0].mxu0 %v67_v45  ;;  %p871_p0 = pnand %p870_p13, %p864_p10 }
  0x5b   :  { %648 = vmatprep.mubr.f32.mxu0 %v68_v47  ;;  %788 = vmatpush3.bf16.msra.mxu1 %v785_v51 }
  0x5e   :  { %649 = vmatmul.mubr.f32.gmra.mrb[2].mxu0 %v69_v50  ;;  %702 = vmatmul.mubr.f32.vlgmr.msra.gmra.mrb[0].mxu1 %v67_v45 }
  0x5f   :  { %651 = vmatprep.mubr.f32.mxu0 %v70_v52  ;;  %704 = vmatprep.mubr.f32.mxu1 %v68_v47 }
  0x62   :  { %652 = vmatmul.mubr.f32.gmra.mrb[4].mxu0 %v71_v53  ;;  %705 = vmatmul.mubr.f32.gmra.mrb[2].mxu1 %v69_v50 }
  0x63   :  { %654 = vmatprep.mubr.f32.mxu0 %v72_v54  ;;  %707 = vmatprep.mubr.f32.mxu1 %v70_v52 }
  0x66   :  { %655 = vmatmul.mubr.f32.gmra.mrb[6].mxu0 %v73_v55  ;;  %708 = vmatmul.mubr.f32.gmra.mrb[4].mxu1 %v71_v53 }
  0x67   :  { %657 = vmatprep.mubr.f32.mxu0 %v74_v56  ;;  %710 = vmatprep.mubr.f32.mxu1 %v72_v54 }
  0x6a   :  { %658 = vmatmul.mubr.f32.gmra.mrb[8].mxu0 %v75_v57  ;;  %711 = vmatmul.mubr.f32.gmra.mrb[6].mxu1 %v73_v55 }
  0x6b   :  { %660 = vmatprep.mubr.f32.mxu0 %v76_v58  ;;  %713 = vmatprep.mubr.f32.mxu1 %v74_v56 }
  0x6e   :  { %661 = vmatmul.mubr.f32.gmra.mrb[10].mxu0 %v77_v59  ;;  %714 = vmatmul.mubr.f32.gmra.mrb[8].mxu1 %v75_v57 }
  0x6f   :  { %663 = vmatprep.mubr.f32.mxu0 %v78_v60  ;;  %716 = vmatprep.mubr.f32.mxu1 %v76_v58 }
  0x72   :  { %664 = vmatmul.mubr.f32.gmra.mrb[12].mxu0 %v79_v61  ;;  %717 = vmatmul.mubr.f32.gmra.mrb[10].mxu1 %v77_v59 }
  0x73   :  { %666 = vmatprep.mubr.f32.mxu0 %v80_v62  ;;  %719 = vmatprep.mubr.f32.mxu1 %v78_v60 }
  0x76   :  { %667 = vmatmul.mubr.f32.gmra.mrb[14].mxu0 %v81_v63  ;;  %720 = vmatmul.mubr.f32.gmra.mrb[12].mxu1 %v79_v61 }
  0x77   :  { %722 = vmatprep.mubr.f32.mxu1 %v80_v62 }
  0x7a   :  { %723 = vmatmul.mubr.f32.gmra.mrb[14].mxu1 %v81_v63 }
 0x12d   :  { %v647_v1 = vpop.f32.mrb[0].mxu0 }
 0x12e   :  { %v177_v2 = vadd.f32 %v647_v1, %v547_v0  ;;  %v171_v3 = vpop.f32.mrb[1].mxu0 }
 0x12f   :  { %v172_v4 = vadd.f32 %v547_v0, %v171_v3 }
 0x130   :  { %419 = vst [vmem:[#allocation8 + $0x8] sm:$0xff] %v177_v2 }
 0x131   :  { %418 = vst [vmem:[#allocation8] sm:$0xff] %v172_v4  ;;  %450 = vxpose.xlu0.b32.start [1/16] %v172_v4, 128  ;;  %v650_v5 = vpop.f32.mrb[2].mxu0  ;;  %v703_v32 = vpop.f32.mrb[0].mxu1 }
 0x132   :  { %v187_v6 = vadd.f32 %v650_v5, %v547_v0  ;;  %v181_v7 = vpop.f32.mrb[3].mxu0  ;;  %v345_v35 = vadd.f32 %v703_v32, %v548_v33  ;;  %v339_v36 = vpop.f32.mrb[1].mxu1 }
 0x133   :  { %v182_v8 = vadd.f32 %v547_v0, %v181_v7  ;;  %v340_v37 = vadd.f32 %v548_v33, %v339_v36 }
 0x134   :  { %421 = vst [vmem:[#allocation8 + $0x18] sm:$0xff] %v187_v6  ;;  %435 = vst [vmem:[#allocation9 + $0x8] sm:$0xff] %v345_v35 }
 0x135   :  { %420 = vst [vmem:[#allocation8 + $0x10] sm:$0xff] %v182_v8  ;;  %451 = vxpose.xlu0.b32.cont [2/16] %v177_v2, 128  ;;  %v653_v9 = vpop.f32.mrb[4].mxu0  ;;  %434 = vst [vmem:[#allocation9] sm:$0xff] %v340_v37  ;;  %v706_v38 = vpop.f32.mrb[2].mxu1 }
 0x136   :  { %v197_v10 = vadd.f32 %v653_v9, %v547_v0  ;;  %v191_v11 = vpop.f32.mrb[5].mxu0  ;;  %v355_v39 = vadd.f32 %v706_v38, %v548_v33  ;;  %v349_v40 = vpop.f32.mrb[3].mxu1 }
 0x137   :  { %v192_v12 = vadd.f32 %v547_v0, %v191_v11  ;;  %v350_v41 = vadd.f32 %v548_v33, %v349_v40 }
 0x138   :  { %423 = vst [vmem:[#allocation8 + $0x28] sm:$0xff] %v197_v10  ;;  %437 = vst [vmem:[#allocation9 + $0x18] sm:$0xff] %v355_v39 }
 0x139   :  { %452 = vxpose.xlu0.b32.cont [3/16] %v182_v8, 128  ;;  %422 = vst [vmem:[#allocation8 + $0x20] sm:$0xff] %v192_v12  ;;  %v656_v13 = vpop.f32.mrb[6].mxu0  ;;  %436 = vst [vmem:[#allocation9 + $0x10] sm:$0xff] %v350_v41  ;;  %v709_v42 = vpop.f32.mrb[4].mxu1 }
 0x13a   :  { %v207_v14 = vadd.f32 %v656_v13, %v547_v0  ;;  %v201_v15 = vpop.f32.mrb[7].mxu0  ;;  %v365_v43 = vadd.f32 %v709_v42, %v548_v33  ;;  %v359_v44 = vpop.f32.mrb[5].mxu1 }
 0x13b   :  { %v202_v16 = vadd.f32 %v547_v0, %v201_v15  ;;  %v360_v45 = vadd.f32 %v548_v33, %v359_v44 }
 0x13c   :  { %425 = vst [vmem:[#allocation8 + $0x38] sm:$0xff] %v207_v14  ;;  %439 = vst [vmem:[#allocation9 + $0x28] sm:$0xff] %v365_v43 }
 0x13d   :  { %453 = vxpose.xlu0.b32.cont [4/16] %v187_v6, 128  ;;  %424 = vst [vmem:[#allocation8 + $0x30] sm:$0xff] %v202_v16  ;;  %v659_v17 = vpop.f32.mrb[8].mxu0  ;;  %438 = vst [vmem:[#allocation9 + $0x20] sm:$0xff] %v360_v45  ;;  %v712_v46 = vpop.f32.mrb[6].mxu1 }
 0x13e   :  { %v217_v18 = vadd.f32 %v659_v17, %v547_v0  ;;  %v211_v19 = vpop.f32.mrb[9].mxu0  ;;  %v375_v47 = vadd.f32 %v712_v46, %v548_v33  ;;  %v369_v48 = vpop.f32.mrb[7].mxu1 }
 0x13f   :  { %v212_v20 = vadd.f32 %v547_v0, %v211_v19  ;;  %v370_v49 = vadd.f32 %v548_v33, %v369_v48 }
 0x140   :  { %427 = vst [vmem:[#allocation8 + $0x48] sm:$0xff] %v217_v18  ;;  %441 = vst [vmem:[#allocation9 + $0x38] sm:$0xff] %v375_v47 }
 0x141   :  { %454 = vxpose.xlu0.b32.cont [5/16] %v192_v12, 128  ;;  %426 = vst [vmem:[#allocation8 + $0x40] sm:$0xff] %v212_v20  ;;  %v662_v21 = vpop.f32.mrb[10].mxu0  ;;  %440 = vst [vmem:[#allocation9 + $0x30] sm:$0xff] %v370_v49  ;;  %v715_v50 = vpop.f32.mrb[8].mxu1 }
 0x142   :  { %v227_v22 = vadd.f32 %v662_v21, %v547_v0  ;;  %v221_v23 = vpop.f32.mrb[11].mxu0  ;;  %v385_v51 = vadd.f32 %v715_v50, %v548_v33  ;;  %v379_v52 = vpop.f32.mrb[9].mxu1 }
 0x143   :  { %v222_v24 = vadd.f32 %v547_v0, %v221_v23  ;;  %v380_v53 = vadd.f32 %v548_v33, %v379_v52 }
 0x144   :  { %429 = vst [vmem:[#allocation8 + $0x58] sm:$0xff] %v227_v22  ;;  %443 = vst [vmem:[#allocation9 + $0x48] sm:$0xff] %v385_v51 }
 0x145   :  { %455 = vxpose.xlu0.b32.cont [6/16] %v197_v10, 128  ;;  %428 = vst [vmem:[#allocation8 + $0x50] sm:$0xff] %v222_v24  ;;  %v665_v25 = vpop.f32.mrb[12].mxu0  ;;  %442 = vst [vmem:[#allocation9 + $0x40] sm:$0xff] %v380_v53  ;;  %v718_v54 = vpop.f32.mrb[10].mxu1 }
 0x146   :  { %v237_v26 = vadd.f32 %v665_v25, %v547_v0  ;;  %v231_v27 = vpop.f32.mrb[13].mxu0  ;;  %v395_v55 = vadd.f32 %v718_v54, %v548_v33  ;;  %v389_v56 = vpop.f32.mrb[11].mxu1 }
 0x147   :  { %v232_v28 = vadd.f32 %v547_v0, %v231_v27  ;;  %v390_v57 = vadd.f32 %v548_v33, %v389_v56 }
 0x148   :  { %431 = vst [vmem:[#allocation8 + $0x68] sm:$0xff] %v237_v26  ;;  %445 = vst [vmem:[#allocation9 + $0x58] sm:$0xff] %v395_v55 }
 0x149   :  { %456 = vxpose.xlu0.b32.cont [7/16] %v202_v16, 128  ;;  %430 = vst [vmem:[#allocation8 + $0x60] sm:$0xff] %v232_v28  ;;  %v668_v29 = vpop.f32.mrb[14].mxu0  ;;  %444 = vst [vmem:[#allocation9 + $0x50] sm:$0xff] %v390_v57  ;;  %v721_v58 = vpop.f32.mrb[12].mxu1 }
 0x14a   :  { %v1040_v30 = vadd.f32 %v668_v29, %v547_v0  ;;  %v241_v31 = vpop.f32.mrb[15].mxu0  ;;  %v405_v59 = vadd.f32 %v721_v58, %v548_v33  ;;  %v399_v60 = vpop.f32.mrb[13].mxu1 }
 0x14b   :  { %v242_v34 = vadd.f32 %v547_v0, %v241_v31  ;;  %v400_v61 = vadd.f32 %v548_v33, %v399_v60 }
 0x14c   :  { %433 = vst [vmem:[#allocation8 + $0x78] sm:$0xff] %v1040_v30  ;;  %447 = vst [vmem:[#allocation9 + $0x68] sm:$0xff] %v405_v59 }
 0x14d   :  { %457 = vxpose.xlu0.b32.cont [8/16] %v207_v14, 128  ;;  %432 = vst [vmem:[#allocation8 + $0x70] sm:$0xff] %v242_v34  ;;  %446 = vst [vmem:[#allocation9 + $0x60] sm:$0xff] %v400_v61  ;;  %v724_v62 = vpop.f32.mrb[14].mxu1 }
 0x14e   :  { %v415_v63 = vadd.f32 %v724_v62, %v548_v33  ;;  %v409_v0 = vpop.f32.mrb[15].mxu1 }
 0x14f   :  { %v410_v1 = vadd.f32 %v548_v33, %v409_v0 }
 0x150   :  { %449 = vst [vmem:[#allocation9 + $0x78] sm:$0xff] %v415_v63 }
 0x151   :  { %458 = vxpose.xlu0.b32.cont [9/16] %v212_v20, 128  ;;  %448 = vst [vmem:[#allocation9 + $0x70] sm:$0xff] %v410_v1 }
 0x155   :  { %459 = vxpose.xlu0.b32.cont [10/16] %v217_v18, 128 }
 0x159   :  { %460 = vxpose.xlu0.b32.cont [11/16] %v222_v24, 128 }
 0x15d   :  { %461 = vxpose.xlu0.b32.cont [12/16] %v227_v22, 128 }
 0x161   :  { %462 = vxpose.xlu0.b32.cont [13/16] %v232_v28, 128 }
 0x165   :  { %463 = vxpose.xlu0.b32.cont [14/16] %v237_v26, 128 }
 0x169   :  { %464 = vxpose.xlu0.b32.cont [15/16] %v242_v34, 128 }
 0x16d   :  { %465 = vxpose.xlu0.b32.end [16/16] %v1040_v30, 128 }
 0x16e   :  { %874 = shalt.err (!%p871_p0)
}
 0x16f   :  { %s875_s24 = scalar_lea.hbm %s1098_s6, 2048 }
 0x170   :  { %p876_p1 = scmp.ne.s32.totalorder %s1098_s6, %s875_s24  ;;  %p879_p2 = scmp.lt.u32.totalorder %s875_s24, %s1098_s6 }
 0x172   :  { %p881_p3 = pnand %p879_p2, %p876_p1 }
 0x174   :  { %884 = shalt.err (!%p881_p3)
}
 0x175   :  { %521 = dma.vmem_to_hbm [thread:$0]  %s516_s18, 2048, %s1098_s6, [#allocation10], %s939_s13, %s939_s13, %s940_s14  }
 0x176   :  { %s885_s8 = scalar_lea.vmem %s504_s20, 2048  ;;  %p890_p5 = scmp.lt.s32.totalorder %s504_s20, %s504_s20 }
 0x177   :  { %p886_p4 = scmp.ne.s32.totalorder %s504_s20, %s885_s8  ;;  %p891_p6 = scmp.lt.s32.totalorder %s885_s8, %s885_s8 }
 0x179   :  { %p892_p7 = por %p891_p6, %p890_p5 }
 0x17b   :  { %p893_p8 = pnand %p892_p7, %p886_p4 }
 0x17d   :  { %896 = shalt.err (!%p893_p8)
}
 0x17e   :  { %s897_s11 = scalar_lea.hbm %s1097_s5, 2048 }
 0x17f   :  { %p898_p9 = scmp.ne.s32.totalorder %s1097_s5, %s897_s11  ;;  %p901_p10 = scmp.lt.u32.totalorder %s897_s11, %s1097_s5 }
 0x181   :  { %p903_p11 = pnand %p901_p10, %p898_p9 }
 0x183   :  { %906 = shalt.err (!%p903_p11)
}
 0x184   :  { %509 = dma.vmem_to_hbm [thread:$0]  %s504_s20, 2048, %s1097_s5, [#allocation4], %s939_s13, %s939_s13, %s940_s14  }
 0x185   :  { %s944_s5 = smov [#allocation11]  }
 0x186   :  { %s527_s16 = sshll.u32 %s944_s5, 4  ;;  %s528_s16 = int_to_ptr.vmem [resolvable:$true] %s527_s16 }
 0x187   :  { %s907_s2 = scalar_lea.vmem %s528_s16, 2048  ;;  %p912_p13 = scmp.lt.s32.totalorder %s528_s16, %s528_s16 }
 0x188   :  { %p908_p12 = scmp.ne.s32.totalorder %s528_s16, %s907_s2  ;;  %p913_p0 = scmp.lt.s32.totalorder %s907_s2, %s907_s2 }
 0x18a   :  { %p914_p1 = por %p913_p0, %p912_p13 }
 0x18c   :  { %p915_p2 = pnand %p914_p1, %p908_p12 }
 0x1b1   :  { %v466_v2 = vpop.trf.xlu0 }
 0x1b2   :  { %482 = vst [vmem:[#allocation11] sm:$0xff] %v466_v2 }
 0x1b5   :  { %v467_v3 = vpop.trf.xlu0 }
 0x1b6   :  { %483 = vst [vmem:[#allocation11 + $0x8] sm:$0xff] %v467_v3 }
 0x1b9   :  { %v468_v4 = vpop.trf.xlu0 }
 0x1ba   :  { %484 = vst [vmem:[#allocation11 + $0x10] sm:$0xff] %v468_v4 }
 0x1bd   :  { %v469_v5 = vpop.trf.xlu0 }
 0x1be   :  { %485 = vst [vmem:[#allocation11 + $0x18] sm:$0xff] %v469_v5 }
 0x1c1   :  { %v470_v6 = vpop.trf.xlu0 }
 0x1c2   :  { %486 = vst [vmem:[#allocation11 + $0x20] sm:$0xff] %v470_v6 }
 0x1c5   :  { %v471_v7 = vpop.trf.xlu0 }
 0x1c6   :  { %487 = vst [vmem:[#allocation11 + $0x28] sm:$0xff] %v471_v7 }
 0x1c9   :  { %v472_v8 = vpop.trf.xlu0 }
 0x1ca   :  { %488 = vst [vmem:[#allocation11 + $0x30] sm:$0xff] %v472_v8 }
 0x1cd   :  { %v473_v9 = vpop.trf.xlu0 }
 0x1ce   :  { %489 = vst [vmem:[#allocation11 + $0x38] sm:$0xff] %v473_v9 }
 0x1d1   :  { %v474_v10 = vpop.trf.xlu0 }
 0x1d2   :  { %490 = vst [vmem:[#allocation11 + $0x40] sm:$0xff] %v474_v10 }
 0x1d5   :  { %v475_v11 = vpop.trf.xlu0 }
 0x1d6   :  { %491 = vst [vmem:[#allocation11 + $0x48] sm:$0xff] %v475_v11 }
 0x1d9   :  { %v476_v12 = vpop.trf.xlu0 }
 0x1da   :  { %492 = vst [vmem:[#allocation11 + $0x50] sm:$0xff] %v476_v12 }
 0x1dd   :  { %v477_v13 = vpop.trf.xlu0 }
 0x1de   :  { %493 = vst [vmem:[#allocation11 + $0x58] sm:$0xff] %v477_v13 }
 0x1e1   :  { %v478_v14 = vpop.trf.xlu0 }
 0x1e2   :  { %494 = vst [vmem:[#allocation11 + $0x60] sm:$0xff] %v478_v14 }
 0x1e5   :  { %v479_v15 = vpop.trf.xlu0 }
 0x1e6   :  { %495 = vst [vmem:[#allocation11 + $0x68] sm:$0xff] %v479_v15 }
 0x1e9   :  { %v480_v16 = vpop.trf.xlu0 }
 0x1ea   :  { %496 = vst [vmem:[#allocation11 + $0x70] sm:$0xff] %v480_v16 }
 0x1ed   :  { %v481_v17 = vpop.trf.xlu0 }
 0x1ee   :  { %497 = vst [vmem:[#allocation11 + $0x78] sm:$0xff] %v481_v17 }
 0x1ef   :  { %918 = shalt.err (!%p915_p2)
}
 0x1f0   :  { %s919_s18 = scalar_lea.hbm %s1099_s7, 2048 }
 0x1f1   :  { %p920_p3 = scmp.ne.s32.totalorder %s1099_s7, %s919_s18  ;;  %p923_p4 = scmp.lt.u32.totalorder %s919_s18, %s1099_s7 }
 0x1f3   :  { %p925_p5 = pnand %p923_p4, %p920_p3 }
 0x1f5   :  { %928 = shalt.err (!%p925_p5)
}
 0x1f6   :  { %533 = dma.vmem_to_hbm [thread:$0]  %s528_s16, 2048, %s1099_s7, [#allocation10], %s939_s13, %s939_s13, %s940_s14  }
 0x1f7   :  { %933 = dma.done.wait [#allocation4], 2048  }
 0x1f8   :  { %934 = vsyncadd [#allocation4], 4294965248 }
 0x1f9   :  { %935 = dma.done.wait [#allocation10], 4096  }
 0x1fa   :  { %936 = vsyncadd [#allocation10], 4294963200 }
 0x1fb   :  { %543 = vsyncpa [#allocation3], 1 }
 0x1fc   :  { %544 = vsyncpa [#allocation6], 1 }
 0x1fd   :  { %545 = vsyncpa [#allocation4], 1 }
 0x1fe   :  { %546 = vsyncpa [#allocation10], 1 }

</bundles_post_ra>
